<compile_context>
chip_gen: v7x
topology: tpu7x:2x2x1
jax: 0.10.0
libtpu: 0.0.40
codegen_flags: <defaults>
</compile_context>

<pallas_src>
import functools

import jax
import jax.numpy as jnp
from jax import lax
from jax.experimental import pallas as pl
from jax.experimental.pallas import tpu as pltpu


def end_mlp_kernel(x_ref, w1_ref, b1_ref, w2_ref, b2_ref, w3_ref, b3_ref, o_ref,
                   *, compute_dtype):
    # One batch tile per grid step; whole 3-layer MLP fused, batch on the lane axis.
    x = x_ref[...].astype(compute_dtype)                     # (bt, d_in)

    # Layer 1: (H, d_in) x (bt, d_in) contracted on last dims -> (H, bt)  [lane = batch]
    h1 = lax.dot_general(
        w1_ref[...].astype(compute_dtype), x,
        dimension_numbers=(((1,), (1,)), ((), ())),
        preferred_element_type=jnp.float32,
    )
    h1 = jnp.maximum(h1 + b1_ref[...], 0.0)                  # bias (H,1) bcast over lanes

    # Layer 2: (H, H) @ (H, bt) -> (H, bt)
    h2 = jnp.dot(w2_ref[...].astype(compute_dtype), h1.astype(compute_dtype),
                 preferred_element_type=jnp.float32)
    h2 = jnp.maximum(h2 + b2_ref[...], 0.0)

    # Layer 3: (1, H) @ (H, bt) -> (1, bt), lane-dense output row.
    logits = jnp.dot(w3_ref[...].astype(compute_dtype), h2.astype(compute_dtype),
                     preferred_element_type=jnp.float32) + b3_ref[0, 0]

    o_ref[...] = jax.nn.sigmoid(logits).astype(o_ref.dtype)  # (1, bt)


def _round_up(x, m):
    return ((x + m - 1) // m) * m


def _pick_batch_tile(B, requested, max_tile=8192):
    # Batch sits on the lane axis of activations and output -> multiple of 128.
    bt = max(128, min(requested, max_tile))
    bt = _round_up(bt, 128)
    # Never allocate a tile larger than the (128-rounded) batch itself.
    bt = min(bt, _round_up(B, 128))
    return bt


def end_mlp(x, params, *, batch_tile=4096, matmul_dtype=None):
    """x: (B, hidden+z) float32. params: dict of w1,b1,w2,b2,w3,b3 (PyTorch layout).
    Returns (B, 1) float32."""
    B, d_in = x.shape
    w1, b1, w2, b2, w3, b3 = (params[k] for k in ("w1", "b1", "w2", "b2", "w3", "b3"))
    hidden = w1.shape[0]
    compute_dtype = jnp.dtype(matmul_dtype) if matmul_dtype is not None else x.dtype

    bt = _pick_batch_tile(B, batch_tile)
    grid_len = pl.cdiv(B, bt)          # ragged final block; no jnp.pad copy of x

    idx_batch = lambda i: (i, 0)
    idx_const = lambda i: (0, 0)       # weights/biases resident across the whole grid

    in_specs = [
        pl.BlockSpec((bt, d_in), idx_batch),                    # x batch tile
        pl.BlockSpec((hidden, d_in), idx_const),                # w1 (out,in)
        pl.BlockSpec((hidden, 1), idx_const),                   # b1 column
        pl.BlockSpec((hidden, hidden), idx_const),              # w2
        pl.BlockSpec((hidden, 1), idx_const),                   # b2 column
        pl.BlockSpec((1, hidden), idx_const),                   # w3 row
        pl.BlockSpec(memory_space=pltpu.MemorySpace.SMEM),      # b3 scalar
    ]
    out_specs = pl.BlockSpec((1, bt), lambda i: (0, i))         # lane-dense output row

    out_row = pl.pallas_call(
        functools.partial(end_mlp_kernel, compute_dtype=compute_dtype),
        out_shape=jax.ShapeDtypeStruct((1, B), jnp.float32),
        grid=(grid_len,),
        in_specs=in_specs,
        out_specs=out_specs,
        compiler_params=pltpu.CompilerParams(
            dimension_semantics=("parallel",)),                 # batch grid -> both TCs on v7x
    )(x, w1, b1, w2, b2, w3, b3)

    return out_row.reshape(B, 1)


def init_params(key, hidden_size, z_size):
    """Matches End_MLP.init_weights: W ~ U(-0.1, 0.1), b = 0.
    Weights kept in PyTorch (out_features, in_features) layout; biases as columns."""
    d_in = hidden_size + z_size
    k1, k2, k3 = jax.random.split(key, 3)
    return {
        "w1": jax.random.uniform(k1, (hidden_size, d_in), jnp.float32, -0.1, 0.1),
        "b1": jnp.zeros((hidden_size, 1), jnp.float32),
        "w2": jax.random.uniform(k2, (hidden_size, hidden_size), jnp.float32, -0.1, 0.1),
        "b2": jnp.zeros((hidden_size, 1), jnp.float32),
        "w3": jax.random.uniform(k3, (1, hidden_size), jnp.float32, -0.1, 0.1),
        "b3": jnp.zeros((1, 1), jnp.float32),
    }


def end_mlp_ref(x, p):
    """Pure-JAX reference of the PyTorch forward (y = x @ W.T + b)."""
    h = jnp.maximum(x @ p["w1"].T + p["b1"].T, 0.0)
    h = jnp.maximum(h @ p["w2"].T + p["b2"].T, 0.0)
    return jax.nn.sigmoid(h @ p["w3"].T + p["b3"])


if __name__ == "__main__":
    hidden_size, z_size, batch = 32, 16, 300   # batch deliberately not a multiple of 128

    key = jax.random.PRNGKey(0)
    k_param, k_x = jax.random.split(key)
    params = init_params(k_param, hidden_size, z_size)
    x = jax.random.normal(k_x, (batch, hidden_size + z_size), jnp.float32)

    # batch_tile=128 here so the test exercises a 3-step grid with a ragged final
    # block; production default stays 4096.
    out = end_mlp(x, params, batch_tile=128)
    out = jax.block_until_ready(out)

    ref = end_mlp_ref(x, params)
    assert out.shape == (batch, 1)
    assert jnp.allclose(out, ref, atol=1e-5, rtol=1e-5), "mismatch vs reference"

    print("KERNEL_OK")
</pallas_src>

<mosaic_0001>
module attributes {stable_mosaic.version = 11 : i64} {
  func.func @end_mlp_kernel(%arg0: i32, %arg1: memref<128x48xf32, #tpu.memory_space<vmem>>, %arg2: memref<32x48xf32, #tpu.memory_space<vmem>>, %arg3: memref<32x1xf32, #tpu.memory_space<vmem>>, %arg4: memref<32x32xf32, #tpu.memory_space<vmem>>, %arg5: memref<32x1xf32, #tpu.memory_space<vmem>>, %arg6: memref<1x32xf32, #tpu.memory_space<vmem>>, %arg7: memref<1x1xf32, #tpu.memory_space<smem>>, %arg8: memref<1x128xf32, #tpu.memory_space<vmem>>) attributes {dimension_semantics = [#tpu.dimension_semantics<parallel>], iteration_bounds = array<i64: 3>, scalar_prefetch = 0 : i64, scratch_operands = 0 : i64, tpu.core_type = #tpu.core_type<tc>, window_params = [{transform_indices = @transform_0, window_bounds = array<i64: 128, 48>}, {pipeline_mode = #tpu.pipeline_mode<synchronous>, transform_indices = @transform_1, window_bounds = array<i64: 32, 48>}, {pipeline_mode = #tpu.pipeline_mode<synchronous>, transform_indices = @transform_2, window_bounds = array<i64: 32, 1>}, {pipeline_mode = #tpu.pipeline_mode<synchronous>, transform_indices = @transform_3, window_bounds = array<i64: 32, 32>}, {pipeline_mode = #tpu.pipeline_mode<synchronous>, transform_indices = @transform_4, window_bounds = array<i64: 32, 1>}, {pipeline_mode = #tpu.pipeline_mode<synchronous>, transform_indices = @transform_5, window_bounds = array<i64: 1, 32>}, {transform_indices = @transform_6, window_bounds = array<i64: 1, 1>}, {transform_indices = @transform_7, window_bounds = array<i64: 1, 128>}]} {
    %c0 = arith.constant 0 : index
    %c0_0 = arith.constant 0 : index
    %0 = vector.load %arg1[%c0, %c0_0] : memref<128x48xf32, #tpu.memory_space<vmem>>, vector<128x48xf32>
    %c0_1 = arith.constant 0 : index
    %c0_2 = arith.constant 0 : index
    %1 = vector.load %arg2[%c0_1, %c0_2] : memref<32x48xf32, #tpu.memory_space<vmem>>, vector<32x48xf32>
    %cst = arith.constant dense<0.000000e+00> : vector<32x128xf32>
    %2 = tpu.matmul %1, %0, %cst {dimension_numbers = #tpu.dot_dimension_numbers<[1], [1], [0], [0], [0, 0, 1, 0], [], []>} : vector<32x48xf32>, vector<128x48xf32>, vector<32x128xf32> -> vector<32x128xf32>
    %c0_3 = arith.constant 0 : index
    %c0_4 = arith.constant 0 : index
    %3 = vector.load %arg3[%c0_3, %c0_4] : memref<32x1xf32, #tpu.memory_space<vmem>>, vector<32x1xf32>
    %4 = vector.broadcast %3 : vector<32x1xf32> to vector<32x128xf32>
    %5 = arith.addf %2, %4 : vector<32x128xf32>
    %cst_5 = arith.constant 0.000000e+00 : f32
    %6 = vector.broadcast %cst_5 : f32 to vector<32x128xf32>
    %7 = arith.maximumf %5, %6 : vector<32x128xf32>
    %c0_6 = arith.constant 0 : index
    %c0_7 = arith.constant 0 : index
    %8 = vector.load %arg4[%c0_6, %c0_7] : memref<32x32xf32, #tpu.memory_space<vmem>>, vector<32x32xf32>
    %cst_8 = arith.constant dense<0.000000e+00> : vector<32x128xf32>
    %9 = tpu.matmul %8, %7, %cst_8 {dimension_numbers = #tpu.dot_dimension_numbers<[1], [0], [0], [1], [0, 0, 1, 1], [], []>} : vector<32x32xf32>, vector<32x128xf32>, vector<32x128xf32> -> vector<32x128xf32>
    %c0_9 = arith.constant 0 : index
    %c0_10 = arith.constant 0 : index
    %10 = vector.load %arg5[%c0_9, %c0_10] : memref<32x1xf32, #tpu.memory_space<vmem>>, vector<32x1xf32>
    %11 = vector.broadcast %10 : vector<32x1xf32> to vector<32x128xf32>
    %12 = arith.addf %9, %11 : vector<32x128xf32>
    %cst_11 = arith.constant 0.000000e+00 : f32
    %13 = vector.broadcast %cst_11 : f32 to vector<32x128xf32>
    %14 = arith.maximumf %12, %13 : vector<32x128xf32>
    %c0_12 = arith.constant 0 : index
    %c0_13 = arith.constant 0 : index
    %15 = vector.load %arg6[%c0_12, %c0_13] : memref<1x32xf32, #tpu.memory_space<vmem>>, vector<1x32xf32>
    %cst_14 = arith.constant dense<0.000000e+00> : vector<1x128xf32>
    %16 = tpu.matmul %15, %14, %cst_14 {dimension_numbers = #tpu.dot_dimension_numbers<[1], [0], [0], [1], [0, 0, 1, 1], [], []>} : vector<1x32xf32>, vector<32x128xf32>, vector<1x128xf32> -> vector<1x128xf32>
    %c0_15 = arith.constant 0 : index
    %c0_16 = arith.constant 0 : index
    %17 = memref.load %arg7[%c0_15, %c0_16] : memref<1x1xf32, #tpu.memory_space<smem>>
    %18 = vector.broadcast %17 : f32 to vector<1x128xf32>
    %19 = arith.addf %16, %18 : vector<1x128xf32>
    %20 = arith.negf %19 : vector<1x128xf32>
    %21 = math.exp %20 : vector<1x128xf32>
    %cst_17 = arith.constant 1.000000e+00 : f32
    %22 = vector.broadcast %cst_17 : f32 to vector<1x128xf32>
    %23 = arith.addf %22, %21 : vector<1x128xf32>
    %24 = arith.divf %22, %23 : vector<1x128xf32>
    %c0_18 = arith.constant 0 : index
    %c0_19 = arith.constant 0 : index
    %25 = vector.load %arg8[%c0_18, %c0_19] : memref<1x128xf32, #tpu.memory_space<vmem>>, vector<1x128xf32>
    tpu.vector_store %arg8[%c0_18, %c0_19], %24 {strides = array<i32>} : memref<1x128xf32, #tpu.memory_space<vmem>>, vector<1x128xf32>,
    return
  }
  func.func @transform_0(%arg0: i32) -> (i32, i32) {
    %c0_i32 = arith.constant 0 : i32
    %c0_i32_0 = arith.constant 0 : i32
    return %arg0, %c0_i32 : i32, i32
  }
  func.func @transform_1(%arg0: i32) -> (i32, i32) {
    %c0_i32 = arith.constant 0 : i32
    %c0_i32_0 = arith.constant 0 : i32
    %c0_i32_1 = arith.constant 0 : i32
    return %c0_i32, %c0_i32_0 : i32, i32
  }
  func.func @transform_2(%arg0: i32) -> (i32, i32) {
    %c0_i32 = arith.constant 0 : i32
    %c0_i32_0 = arith.constant 0 : i32
    %c0_i32_1 = arith.constant 0 : i32
    return %c0_i32, %c0_i32_0 : i32, i32
  }
  func.func @transform_3(%arg0: i32) -> (i32, i32) {
    %c0_i32 = arith.constant 0 : i32
    %c0_i32_0 = arith.constant 0 : i32
    %c0_i32_1 = arith.constant 0 : i32
    return %c0_i32, %c0_i32_0 : i32, i32
  }
  func.func @transform_4(%arg0: i32) -> (i32, i32) {
    %c0_i32 = arith.constant 0 : i32
    %c0_i32_0 = arith.constant 0 : i32
    %c0_i32_1 = arith.constant 0 : i32
    return %c0_i32, %c0_i32_0 : i32, i32
  }
  func.func @transform_5(%arg0: i32) -> (i32, i32) {
    %c0_i32 = arith.constant 0 : i32
    %c0_i32_0 = arith.constant 0 : i32
    %c0_i32_1 = arith.constant 0 : i32
    return %c0_i32, %c0_i32_0 : i32, i32
  }
  func.func @transform_6(%arg0: i32) -> (i32, i32) {
    %c0_i32 = arith.constant 0 : i32
    %c0_i32_0 = arith.constant 0 : i32
    %c0_i32_1 = arith.constant 0 : i32
    return %c0_i32, %c0_i32_0 : i32, i32
  }
  func.func @transform_7(%arg0: i32) -> (i32, i32) {
    %c0_i32 = arith.constant 0 : i32
    %c0_i32_0 = arith.constant 0 : i32
    return %c0_i32, %arg0 : i32, i32
  }
}

</mosaic_0001>

<bundles_post_ra>
// kernel: tpu_custom_call.1
= control target key start
LH: loop header
LB: loop body
LE: loop exit
PB: predicated region body
PF: predicated region fallthrough
CT: control target
= control target key end

     0   :  { %s1343_s0 = inlined_call_operand.vmem [shape: f32[300,48], index: 0, kind: input, shape index: {}]   ;;  %s1344_s1 = inlined_call_operand.vmem [shape: f32[32,48], index: 1, kind: input, shape index: {}]   ;;  %s1345_s2 = inlined_call_operand.vmem [shape: f32[32,1], index: 2, kind: input, shape index: {}]   ;;  %s1346_s3 = inlined_call_operand.vmem [shape: f32[32,32], index: 3, kind: input, shape index: {}]   ;;  %s1347_s4 = inlined_call_operand.vmem [shape: f32[32,1], index: 4, kind: input, shape index: {}]   ;;  %s1348_s5 = inlined_call_operand.vmem [shape: f32[1,32], index: 5, kind: input, shape index: {}]   ;;  %s1349_s6 = inlined_call_operand.<no memory space> [shape: f32[1,1], index: 6, kind: input, shape index: {}]   ;;  %s1350_s7 = inlined_call_operand.hbm [shape: f32[1,300], index: 7, kind: output, shape index: {}]  }
   0x1   :  { %12 = sst [smem:[#allocation2]] %s1349_s6 }
   0x2   :  { %13 = vsyncpa [#allocation4], 0 }
   0x3   :  { %15 = vsyncpa [#allocation4 + $0x1], 0  ;;  %s1128_s26 = smov 0   ;;  %s1130_s27 = smov 0  }
   0x4   :  { %s1132_s28 = smov 0   ;;  %s1134_s29 = smov 0  }
   0x5 LB: > { %s773_s6 = sadd.s32 4294967295, %s1078_s29   ;;  %s774_s30 = sadd.s32 4294967294, %s1078_s29   ;;  %s1078_s29 = sphi %s1134_s29, %s1358_s29   ;;  %s1074_s28 = sphi %s1132_s28, %s1357_s28   ;;  %s1070_s27 = sphi %s1130_s27, %s1356_s27   ;;  %s1066_s26 = sphi %s1128_s26, %s1355_s26  }
   0x6   : > { %s1151_s8 = sadd.s32 1, %s1078_s29   ;;  %s180_s9 = sadd.s32 1, %s1074_s28 }
   0x7   : > { %s177_s10 = ssub.s32 %s1078_s29, %s1151_s8  ;;  %p190_p0 = scmp.ne.s32.totalorder %s1074_s28, %s1070_s27 }
   0x8   : > { %p178_p1 = scmp.eq.s32.totalorder %s177_s10, 0  ;;  %p191_p2 = scmp.eq.s32.totalorder %s773_s6, 2 }
   0x9   : > { %p196_p3 = scmp.ne.s32.totalorder %s1070_s27, %s1066_s26  ;;  %p197_p4 = scmp.eq.s32.totalorder %s774_s30, 2 }
   0xa   : > { %s1161_s11 = scalar_select %p178_p1, %s1074_s28, %s180_s9  }
   0xb   : > { %p1163_p5 = por %p191_p2, %p190_p0  ;;  %p1167_p6 = por %p197_p4, %p196_p3 }
   0xc   : > { %p777_p7 = scmp.ge.s32.totalorder %s1078_s29, 1  ;;  %p250_p8 = scmp.lt.s32.totalorder %s1078_s29, 4 }
   0xe   : > { %p251_p9 = pnand %p777_p7, %p250_p8 }
   0xf   : > { %s1173_s14 = sshll.u32 (!%p251_p9), %s773_s6, 4  ;;  %vm343_vm0 = vcmask (!%p251_p9), 392192   ;;  %v315_v0 = vld [vmem:[%s1344_s1] sm:$0xff] (!%p251_p9)  ;;  %v1080_v1 = vmov (!%p251_p9), 0   ;;  %v321_v3 = vld [vmem:[%s1345_s2 + $0x10] sm:$0xff] (!%p251_p9)  ;;  %v320_v4 = vld [vmem:[%s1345_s2 + $0x8] sm:$0xff] (!%p251_p9) }
  0x10   : > { %254 = sbr.rel (%p251_p9) target bundleno = 801 (0x321), region = 48  ;;  %p290_p10 = scmp.lt.s32.totalorder (!%p251_p9), %s1173_s14, 37  ;;  %874 = vmatprep.mubr.msk.f32.mxu0 (!%p251_p9), %vm343_vm0, %v315_v0  ;;  %1010 = vset.pattern.permute.xlu0 (!%p251_p9), %v1080_v1  ;;  %v319_v2 = vld [vmem:[%s1345_s2] sm:$0xff] (!%p251_p9)  ;;  %v322_v5 = vld [vmem:[%s1345_s2 + $0x18] sm:$0xff] (!%p251_p9)  ;;  %vm1200_vm1 = vmpackc.low (!%p251_p9), %vm343_vm0, %vm343_vm0  ;;  %vm521_vm2 = vcmask (!%p251_p9), 261120   ;;  %v1081_v60 = vmov (!%p251_p9), 0.0|0.0  }
  0x11   : > { %325 = vperm.xlu0 (!%p251_p9), %1010, %v319_v2   ;;  %1011 = vset.pattern.permute.xlu1 (!%p251_p9), %v1080_v1  ;;  %v497_v7 = vld [vmem:[%s1347_s4] sm:$0xff] (!%p251_p9)  ;;  %v498_v13 = vld [vmem:[%s1347_s4 + $0x8] sm:$0xff] (!%p251_p9)  ;;  %v499_v15 = vld [vmem:[%s1347_s4 + $0x10] sm:$0xff] (!%p251_p9)  ;;  %vm1082_vm3 = vmmov (!%p251_p9), 0   ;;  %v1083_v61 = vmov (!%p251_p9), 0.0   ;;  %s624_s24 = sld [smem:[#allocation2]] (!%p251_p9)  ;;  %s1301_s15 = scalar_lea.hbm (!%p251_p9), %s1350_s7, %s1173_s14 }
  0x12   : > { %335 = vperm.xlu1 (!%p251_p9), %1011, %v321_v3   ;;  %v500_v16 = vld [vmem:[%s1347_s4 + $0x18] sm:$0xff] (!%p251_p9)  ;;  %v316_v35 = vld [vmem:[%s1344_s1 + $0x8] sm:$0xff] (!%p251_p9)  ;;  %v317_v36 = vld [vmem:[%s1344_s1 + $0x10] sm:$0xff] (!%p251_p9)  ;;  %s283_s25 = sand.u32 (!%p251_p9), 1, %s1070_s27   ;;  %s1084_s18 = smov (!%p251_p9), [#allocation3]  }
  0x13   : > { %v318_v37 = vld [vmem:[%s1344_s1 + $0x18] sm:$0xff] (!%p251_p9)  ;;  %v493_v38 = vld [vmem:[%s1346_s3] sm:$0xff] (!%p251_p9)  ;;  %v494_v57 = vld [vmem:[%s1346_s3 + $0x8] sm:$0xff] (!%p251_p9)  ;;  %s707_s16 = scalar_lea.sflag (!%p251_p9), [#allocation4], %s283_s25  ;;  %s1020_s19 = sshll.u32 (!%p251_p9), %s1084_s18, 4  ;;  %s1021_s19 = int_to_ptr.vmem [resolvable:$false] %s1020_s19 }
  0x14   : > { %888 = vmatprep.mubr.msk.f32.mxu1 (!%p251_p9), %vm521_vm2, %v493_v38  ;;  %v495_v58 = vld [vmem:[%s1346_s3 + $0x10] sm:$0xff] (!%p251_p9)  ;;  %v496_v59 = vld [vmem:[%s1346_s3 + $0x18] sm:$0xff] (!%p251_p9)  ;;  %s1022_s20 = scalar_lea.vmem (!%p251_p9), %s1021_s19, 32 }
  0x15   : > { %330 = vperm.xlu0 (!%p251_p9), %1010, %v320_v4  }
  0x16   : > { %340 = vperm.xlu1 (!%p251_p9), %1011, %v322_v5  }
  0x17   : > { %s291_s21 = scalar_select %p290_p10, %s1173_s14, 37 }
  0x19   : > { %s779_s6 = sshll.u32 %s291_s21, 3  ;;  %503 = vperm.xlu0 %1010, %v497_v7  }
  0x1a   : > { %s1196_s10 = scalar_lea.vmem %s1343_s0, %s779_s6  ;;  %508 = vperm.xlu1 %1011, %v498_v13   ;;  %s284_s6 = scalar_lea.vmem [#allocation3], %s283_s25 }
  0x1b   : > { %v299_v8 = vld [vmem:[%s1196_s10] sm:$0xff]  ;;  %v300_v9 = vld [vmem:[%s1196_s10 + $0x8] sm:$0xff]  ;;  %v301_v10 = vld [vmem:[%s1196_s10 + $0x10] sm:$0xff]  ;;  %s719_s30 = sshll.u32 %s284_s6, 4  ;;  %s1303_s30 = int_to_ptr.vmem [resolvable:$true] %s719_s30 }
  0x1c   : > { %v905_v11 = vpack.c.bf16 %v300_v9, %v299_v8  ;;  %v302_v12 = vld [vmem:[%s1196_s10 + $0x18] sm:$0xff]  ;;  %v303_v17 = vld [vmem:[%s1196_s10 + $0x20] sm:$0xff]  ;;  %v304_v18 = vld [vmem:[%s1196_s10 + $0x28] sm:$0xff]  ;;  %s1016_s17 = scalar_lea.vmem %s1303_s30, 16  ;;  %p1023_p0 = scmp.lt.s32.totalorder %s1303_s30, %s1021_s19 }
  0x1d   : > { %v911_v14 = vpack.c.bf16 %v302_v12, %v301_v10  ;;  %513 = vperm.xlu0 %1010, %v499_v15   ;;  %v917_v19 = vpack.c.bf16 %v304_v18, %v303_v17  ;;  %v305_v20 = vld [vmem:[%s1196_s10 + $0x30] sm:$0xff]  ;;  %v306_v21 = vld [vmem:[%s1196_s10 + $0x38] sm:$0xff]  ;;  %v307_v23 = vld [vmem:[%s1196_s10 + $0x40] sm:$0xff]  ;;  %v625_v17 = vstv %s624_s24  ;;  %p1017_p11 = scmp.ne.s32.totalorder %s1303_s30, %s1016_s17  ;;  %p1024_p1 = scmp.lt.s32.totalorder %s1022_s20, %s1016_s17 }
  0x1e   : > { %907 = vmatprep.subr.msk.bf16.mxu0 %vm1200_vm1, %v905_v11  ;;  %518 = vperm.xlu1 %1011, %v500_v16   ;;  %v923_v22 = vpack.c.bf16 %v306_v21, %v305_v20  ;;  %v308_v24 = vld [vmem:[%s1196_s10 + $0x48] sm:$0xff]  ;;  %v309_v26 = vld [vmem:[%s1196_s10 + $0x50] sm:$0xff]  ;;  %v310_v27 = vld [vmem:[%s1196_s10 + $0x58] sm:$0xff] }
  0x1f   : > { %910 = vmatpush3.bf16.xpose.msk.msra.mxu0 %vm1200_vm1, %v905_v11  ;;  %v929_v25 = vpack.c.bf16 %v308_v24, %v307_v23  ;;  %v935_v28 = vpack.c.bf16 %v310_v27, %v309_v26  ;;  %v311_v29 = vld [vmem:[%s1196_s10 + $0x60] sm:$0xff]  ;;  %v312_v30 = vld [vmem:[%s1196_s10 + $0x68] sm:$0xff]  ;;  %v313_v32 = vld [vmem:[%s1196_s10 + $0x70] sm:$0xff]  ;;  %p1018_p12 = pnand %p1017_p11, %p1163_p5  ;;  %p1025_p2 = por %p1024_p1, %p1023_p0 }
  0x20   : > { %913 = vmatprep.subr.msk.bf16.mxu0 %vm1200_vm1, %v911_v14  ;;  %v941_v31 = vpack.c.bf16 %v312_v30, %v311_v29  ;;  %v314_v33 = vld [vmem:[%s1196_s10 + $0x78] sm:$0xff]  ;;  %v623_v16 = vld [vmem:[%s1348_s5] sm:$0x1] }
  0x21   : > { %v947_v34 = vpack.c.bf16 %v314_v33, %v313_v32  ;;  %p1019_p13 = pneg %p1018_p12 }
  0x23   : > { %p1026_p3 = pnand %p1025_p2, %p1019_p13 }
  0x27   : > { %916 = vmatpush3.bf16.xpose.msk.msra.mxu0 %vm1200_vm1, %v911_v14 }
  0x28   : > { %919 = vmatprep.subr.msk.bf16.mxu0 %vm1200_vm1, %v917_v19 }
  0x2f   : > { %922 = vmatpush3.bf16.xpose.msk.msra.mxu0 %vm1200_vm1, %v917_v19 }
  0x30   : > { %925 = vmatprep.subr.msk.bf16.mxu0 %vm1200_vm1, %v923_v22 }
  0x37   : > { %928 = vmatpush3.bf16.xpose.msk.msra.mxu0 %vm1200_vm1, %v923_v22 }
  0x38   : > { %931 = vmatprep.subr.msk.bf16.mxu0 %vm1200_vm1, %v929_v25 }
  0x3f   : > { %934 = vmatpush3.bf16.xpose.msk.msra.mxu0 %vm1200_vm1, %v929_v25 }
  0x40   : > { %937 = vmatprep.subr.msk.bf16.mxu0 %vm1200_vm1, %v935_v28 }
  0x47   : > { %940 = vmatpush3.bf16.xpose.msk.msra.mxu0 %vm1200_vm1, %v935_v28 }
  0x48   : > { %943 = vmatprep.subr.msk.bf16.mxu0 %vm1200_vm1, %v941_v31 }
  0x4f   : > { %946 = vmatpush3.bf16.xpose.msk.msra.mxu0 %vm1200_vm1, %v941_v31 }
  0x50   : > { %949 = vmatprep.subr.msk.bf16.mxu0 %vm1200_vm1, %v947_v34 }
  0x57   : > { %952 = vmatpush3.bf16.xpose.msk.msra.mxu0 %vm1200_vm1, %v947_v34 }
  0x5e   : > { %875 = vmatmul.mubr.msk.f32.vlgmr.msra.gmra.mrb[0].mxu0 %vm343_vm0, %v316_v35 }
  0x5f   : > { %877 = vmatprep.mubr.msk.f32.mxu0 %vm343_vm0, %v317_v36 }
  0x62   : > { %878 = vmatmul.mubr.msk.f32.gmra.mrb[2].mxu0 %vm343_vm0, %v318_v37 }
  0x90   : > { %v326_v39 = vpop.permute.xlu0 %325 }
  0x91   : > { %v336_v40 = vpop.permute.xlu1 %335 }
  0x94   : > { %v331_v41 = vpop.permute.xlu0 %330 }
  0x95   : > { %v341_v47 = vpop.permute.xlu1 %340 }
  0x98   : > { %v504_v63 = vpop.permute.xlu0 %503 }
  0x99   : > { %v509_v62 = vpop.permute.xlu1 %508 }
  0x9c   : > { %v514_v8 = vpop.permute.xlu0 %513 }
  0x9d   : > { %v519_v5 = vpop.permute.xlu1 %518 }
 0x131   : > { %v876_v42 = vpop.f32.mrb[0].mxu0 }
 0x132   : > { %v476_v43 = vadd.f32 %v876_v42, %v331_v41  ;;  %v470_v44 = vpop.f32.mrb[1].mxu0 }
 0x133   : > { %v471_v45 = vadd.f32 %v470_v44, %v326_v39 }
 0x134   : > { %v490_v46 = vmax.f32 %v476_v43, 0.0 }
 0x135   : > { %v489_v48 = vmax.f32 %v471_v45, 0.0  ;;  %v879_v49 = vpop.f32.mrb[2].mxu0 }
 0x136   : > { %v486_v50 = vadd.f32 %v879_v49, %v341_v47  ;;  %v480_v51 = vpop.f32.mrb[3].mxu0 }
 0x137   : > { %v481_v52 = vadd.f32 %v480_v51, %v336_v40  ;;  %v953_v53 = vpack.c.bf16 %v490_v46, %v489_v48 }
 0x138   : > { %v492_v54 = vmax.f32 %v486_v50, 0.0 }
 0x139   : > { %v491_v55 = vmax.f32 %v481_v52, 0.0  ;;  %954 = vmatprep.subr.bf16.mxu1 %v953_v53 }
 0x13a   : > { %956 = vmatpush3.bf16.msra.mxu1 %v953_v53 }
 0x13b   : > { %v957_v56 = vpack.c.bf16 %v492_v54, %v491_v55 }
 0x13d   : > { %958 = vmatprep.subr.bf16.mxu1 %v957_v56 }
 0x13e   : > { %960 = vmatpush3.bf16.msra.mxu1 %v957_v56 }
 0x13f   : > { %961 = vmatprep.subr.bf16.mxu1 %v1081_v60 }
 0x141   : > { %889 = vmatmul.mubr.msk.f32.vlgmr.msra.gmra.mrb[0].mxu1 %vm521_vm2, %v494_v57 }
 0x142   : > { %891 = vmatprep.mubr.msk.f32.mxu1 %vm521_vm2, %v495_v58 }
 0x145   : > { %892 = vmatmul.mubr.msk.f32.gmra.mrb[2].mxu1 %vm521_vm2, %v496_v59 }
 0x146   : > { %902 = vmatprep.mubr.msk.f32.mxu1 %vm1082_vm3, %v1083_v61 }
 0x214   : > { %v890_v0 = vpop.f32.mrb[0].mxu1 }
 0x215   : > { %v606_v1 = vadd.f32 %v890_v0, %v509_v62  ;;  %v600_v2 = vpop.f32.mrb[1].mxu1 }
 0x216   : > { %v601_v3 = vadd.f32 %v600_v2, %v504_v63 }
 0x217   : > { %v620_v4 = vmax.f32 %v606_v1, 0.0 }
 0x218   : > { %v619_v6 = vmax.f32 %v601_v3, 0.0  ;;  %v893_v7 = vpop.f32.mrb[2].mxu1 }
 0x219   : > { %v616_v9 = vadd.f32 %v893_v7, %v519_v5  ;;  %v610_v10 = vpop.f32.mrb[3].mxu1 }
 0x21a   : > { %v962_v11 = vpack.c.bf16 %v620_v4, %v619_v6  ;;  %v611_v12 = vadd.f32 %v610_v10, %v514_v8 }
 0x21b   : > { %v622_v13 = vmax.f32 %v616_v9, 0.0 }
 0x21c   : > { %v621_v14 = vmax.f32 %v611_v12, 0.0  ;;  %963 = vmatpush3.bf16.msra.mxu1 %v962_v11 }
 0x21d   : > { %964 = vmatprep.subr.bf16.mxu1 %v1081_v60 }
 0x21e   : > { %v965_v15 = vpack.c.bf16 %v622_v13, %v621_v14 }
 0x220   : > { %966 = vmatpush3.bf16.msra.mxu1 %v965_v15 }
 0x223   : > { %903 = vmatmul.mubr.msk.f32.vlgmr.msra.gmra.mrb[4].mxu1 %vm521_vm2, %v623_v16 }
 0x2f6   : > { %v695_v18 = vpop.f32.mrb[4].mxu1 }
 0x2f7   : > { %v696_v19 = vadd.f32 %v695_v18, %v625_v17  ;;  %v904_v20 = vpop.f32.mrb[5].mxu1 }
 0x2f9   : > { %v805_v21 = vmul.f32 -1.442695, %v696_v19 }
 0x2fb   : > { %1012 = vpow2.f32 %v805_v21 }
 0x305   : > { %v1013_v22 = vpop.eup %1012 }
 0x306   : > { %v702_v23 = vadd.f32 1.0, %v1013_v22 }
 0x308   : > { %1014 = vrcp.f32 %v702_v23 }
 0x312   : > { %v1015_v24 = vpop.eup %1014 }
 0x313   : > { %705 = vst [vmem:[%s284_s6] sm:$0x1] %v1015_v24 }
 0x314   : > { %1029 = shalt.err (!%p1026_p3)
}
 0x315   : > { %s1030_s14 = scalar_lea.hbm %s1301_s15, 16  ;;  %s1034_s23 = scalar_lea.hbm %s1350_s7, 48 }
 0x316   : > { %p1031_p4 = scmp.ne.s32.totalorder %s1301_s15, %s1030_s14  ;;  %p1035_p9 = scmp.lt.u32.totalorder %s1301_s15, %s1350_s7 }
 0x317   : > { %p1036_p10 = scmp.lt.u32.totalorder %s1034_s23, %s1030_s14  ;;  %p1038_p12 = scmp.lt.u32.totalorder %s1030_s14, %s1301_s15 }
 0x318   : > { %p1032_p7 = pnand %p1031_p4, %p1163_p5 }
 0x319   : > { %p1037_p11 = por %p1036_p10, %p1035_p9 }
 0x31a   : > { %p1033_p8 = pneg %p1032_p7 }
 0x31b   : > { %p1039_p13 = por %p1038_p12, %p1037_p11 }
 0x31d   : > { %p1040_p0 = pnand %p1039_p13, %p1033_p8 }
 0x31f   : > { %1043 = shalt.err (!%p1040_p0)
}
 0x320   : > { %967 = dma.vmem_to_hbm [thread:$0]  (%p1163_p5), %s1303_s30, 16, %s1301_s15, %s707_s16  }
 0x321 PF: > { %p973_p1 = scmp.ge.s32.totalorder %s1078_s29, 2  ;;  %s731_s6 = sand.u32 1, %s1066_s26  }
 0x322   : > { %s732_s9 = scalar_lea.sflag [#allocation4], %s731_s6 }
 0x323   : > { %p970_p2 = pnand %p973_p1, %p1167_p6 }
 0x325   : > { %1061 = dma.done.wait (!%p970_p2), %s732_s9, 16  }
 0x326   : > { %1063 = vsyncadd (!%p970_p2), %s732_s9, 4294967280  ;;  %p18_p3 = scmp.ge.s32.totalorder %s1151_s8, 5   ;;  %s1355_s26 = smov %s1070_s27 }
 0x327   : > { %s1356_s27 = smov %s1074_s28  ;;  %s1357_s28 = smov %s1161_s11 }
 0x328   : > { %s1358_s29 = smov %s1151_s8  ;;  %20 = sbr.rel (!%p18_p3) target bundleno = 5 (0x5), region = 83 }
 0x32f   :  { %736 = vsyncpa [#allocation4], 1 }
 0x330   :  { %738 = vsyncpa [#allocation4 + $0x1], 1 }

</bundles_post_ra>
